<compile_context>
chip_gen: v7x
topology: tpu7x:2x2x1
jax: 0.10.0
libtpu: 0.0.40
codegen_flags: <defaults>
</compile_context>

<pallas_src>
import functools
import math

import jax
import jax.numpy as jnp
from jax.experimental import pallas as pl
from jax.experimental.pallas import tpu as pltpu

EPS = 1e-8
LANES = 128           # vreg lane width; padded softmax width inside the kernel
NEG_BIG = -1e30       # finite mask value for padded softmax lanes (NOT -inf:
                      # keeps probs*z == 0 at padded lanes instead of NaN)


def _round_up(x, m):
    return ((x + m - 1) // m) * m


def gating_kernel(x_ref, w1_ref, b1_ref, w2_ref, b2_ref, out_ref, *, m):
    # --- hidden layer: Linear + ReLU (MXU matmul, f32 accumulation) ---
    x = x_ref[...]
    h = jnp.dot(x, w1_ref[...], preferred_element_type=jnp.float32) + b1_ref[...]
    h = jnp.maximum(h, 0.0)

    # --- output layer into a 128-lane padded tile; w2/b2 already carry 1/T ---
    z = jnp.dot(h, w2_ref[...], preferred_element_type=jnp.float32) + b2_ref[...]

    # Mask padded lanes (>= m) out of the softmax.
    lane = jax.lax.broadcasted_iota(jnp.int32, z.shape, dimension=1)
    z = jnp.where(lane < m, z, jnp.float32(NEG_BIG))

    # --- numerically stable softmax over the real m lanes ---
    z = z - jnp.max(z, axis=-1, keepdims=True)
    e = jnp.exp(z)
    s = jnp.sum(e, axis=-1, keepdims=True)
    probs = e * pl.reciprocal(s, approx=False)   # exact: keeps 1e-5 parity w/ ref

    # --- per-sample Shannon entropy from shifted logits (LSE form) ---
    # -sum(p*log p) == log(s) - sum(p * z)   (padded lanes contribute 0)
    ent = jnp.log(s) - jnp.sum(probs * z, axis=-1, keepdims=True)

    # --- narrow output: cols 0..m-1 probs, col m entropy (static slice) ---
    slab = jnp.where(lane == m, ent, probs)
    out_ref[...] = slab[:, : m + 1]


def gating_net_forward(x, w1, b1, w2, b2, log_T, *, min_T=1.5, block_rows=1024):
    """Pallas forward pass of GatingNet (use_softmax=True, learnable_T=True).

    Weights are (in_features, out_features). Returns (probs (B, M), entropy (B,)).
    """
    B, D = x.shape
    H = w1.shape[1]
    M = w2.shape[1]
    assert M + 1 <= LANES, "n_modalities must be < 128"

    # Temperature clamp (torch: log_T.clamp_(min=log(min_T)); T = exp(log_T)).
    # Fold 1/T into the (tiny, resident) second-layer weights while padding
    # them to a full 128-lane tile — no per-tile multiply in the kernel.
    inv_T = jnp.exp(-jnp.maximum(jnp.asarray(log_T, jnp.float32), math.log(min_T)))
    w2p = jnp.zeros((H, LANES), jnp.float32).at[:, :M].set(
        w2.astype(jnp.float32) * inv_T)
    b2p = jnp.zeros((1, LANES), jnp.float32).at[:, :M].set(
        jnp.reshape(b2.astype(jnp.float32) * inv_T, (1, M)))
    b1r = jnp.reshape(b1, (1, H))   # native dtype, resident

    # Batch tiling: TB rows per grid step (multiple of 8).  Aim for >= 2 grid
    # steps when B allows it (v7x megacore), cap at block_rows (default 1024:
    # ~roofline for mem-bound tiles, fits v5e 16 MiB scoped / v7x 64 MiB VMEM).
    block_rows = _round_up(max(int(block_rows), 8), 8)
    TB = min(block_rows, max(8, _round_up(pl.cdiv(B, 2), 8)))
    grid = (pl.cdiv(B, TB),)   # ragged tail handled by the Pallas edge block

    kernel = functools.partial(gating_kernel, m=M)

    out = pl.pallas_call(
        kernel,
        out_shape=jax.ShapeDtypeStruct((B, M + 1), jnp.float32),
        grid=grid,
        in_specs=[
            pl.BlockSpec((TB, D), lambda i: (i, 0)),      # x rows (pipelined, native dtype)
            pl.BlockSpec((D, H), lambda i: (0, 0)),       # w1 (resident)
            pl.BlockSpec((1, H), lambda i: (0, 0)),       # b1 (resident)
            pl.BlockSpec((H, LANES), lambda i: (0, 0)),   # w2 * 1/T, padded (resident)
            pl.BlockSpec((1, LANES), lambda i: (0, 0)),   # b2 * 1/T, padded (resident)
        ],
        out_specs=pl.BlockSpec((TB, M + 1), lambda i: (i, 0)),
        compiler_params=pltpu.CompilerParams(
            dimension_semantics=("parallel",)),
    )(x, w1, b1r, w2p, b2p)

    probs = out[:, :M]
    entropy = out[:, M]
    return probs, entropy


def reference_forward(x, w1, b1, w2, b2, log_T, *, min_T=1.5):
    """Pure-JAX reference matching the PyTorch semantics."""
    T = jnp.exp(jnp.maximum(log_T, math.log(min_T)))
    h = jnp.maximum(x @ w1 + b1, 0.0)
    logits = h @ w2 + b2
    probs = jax.nn.softmax(logits / T, axis=-1)
    entropy = -jnp.sum(probs * jnp.log(probs + EPS), axis=-1)
    return probs, entropy


if __name__ == "__main__":
    # Small shapes consistent with the module:
    #   B=8 samples, input_dim=32, hidden_dims=64, n_modalities=2
    B, D, H, M = 8, 32, 64, 2
    init_T = 2.0

    key = jax.random.PRNGKey(0)
    kx, k1, k2, k3, k4, kx2 = jax.random.split(key, 6)

    # Deterministic parameter init (PyTorch nn.Linear default: U(-1/sqrt(fan_in), +)).
    lim1 = 1.0 / math.sqrt(D)
    lim2 = 1.0 / math.sqrt(H)
    w1 = jax.random.uniform(k1, (D, H), jnp.float32, -lim1, lim1)
    b1 = jax.random.uniform(k2, (H,), jnp.float32, -lim1, lim1)
    w2 = jax.random.uniform(k3, (H, M), jnp.float32, -lim2, lim2)
    b2 = jax.random.uniform(k4, (M,), jnp.float32, -lim2, lim2)
    log_T = jnp.asarray(math.log(init_T), dtype=jnp.float32)

    x = jax.random.normal(kx, (B, D), jnp.float32)

    probs, entropy = gating_net_forward(x, w1, b1, w2, b2, log_T)
    jax.block_until_ready((probs, entropy))

    probs_ref, entropy_ref = reference_forward(x, w1, b1, w2, b2, log_T)
    assert probs.shape == (B, M) and entropy.shape == (B,)
    assert jnp.allclose(probs, probs_ref, atol=1e-5, rtol=1e-5)
    assert jnp.allclose(entropy, entropy_ref, atol=1e-5, rtol=1e-5)

    # Second check: ragged batch exercising the multi-step grid + edge block
    # (B2=1000 with TB=504 -> 2 grid steps, last block reads 8 OOB rows whose
    # writes are dropped).
    B2 = 1000
    x2 = jax.random.normal(kx2, (B2, D), jnp.float32)
    probs2, ent2 = gating_net_forward(x2, w1, b1, w2, b2, log_T, block_rows=512)
    jax.block_until_ready((probs2, ent2))
    probs2_ref, ent2_ref = reference_forward(x2, w1, b1, w2, b2, log_T)
    assert probs2.shape == (B2, M) and ent2.shape == (B2,)
    assert jnp.allclose(probs2, probs2_ref, atol=1e-5, rtol=1e-5)
    assert jnp.allclose(ent2, ent2_ref, atol=1e-5, rtol=1e-5)

    print("KERNEL_OK")
</pallas_src>

<mosaic_0001>
module attributes {stable_mosaic.version = 11 : i64} {
  func.func @gating_kernel(%arg0: i32, %arg1: memref<8x32xf32, #tpu.memory_space<vmem>>, %arg2: memref<32x64xf32, #tpu.memory_space<vmem>>, %arg3: memref<1x64xf32, #tpu.memory_space<vmem>>, %arg4: memref<64x128xf32, #tpu.memory_space<vmem>>, %arg5: memref<1x128xf32, #tpu.memory_space<vmem>>, %arg6: memref<8x3xf32, #tpu.memory_space<vmem>>) attributes {dimension_semantics = [#tpu.dimension_semantics<parallel>], iteration_bounds = array<i64: 1>, scalar_prefetch = 0 : i64, scratch_operands = 0 : i64, tpu.core_type = #tpu.core_type<tc>, window_params = [{transform_indices = @transform_0, window_bounds = array<i64: 8, 32>}, {pipeline_mode = #tpu.pipeline_mode<synchronous>, transform_indices = @transform_1, window_bounds = array<i64: 32, 64>}, {pipeline_mode = #tpu.pipeline_mode<synchronous>, transform_indices = @transform_2, window_bounds = array<i64: 1, 64>}, {pipeline_mode = #tpu.pipeline_mode<synchronous>, transform_indices = @transform_3, window_bounds = array<i64: 64, 128>}, {pipeline_mode = #tpu.pipeline_mode<synchronous>, transform_indices = @transform_4, window_bounds = array<i64: 1, 128>}, {transform_indices = @transform_5, window_bounds = array<i64: 8, 3>}]} {
    %c0 = arith.constant 0 : index
    %c0_0 = arith.constant 0 : index
    %0 = vector.load %arg1[%c0, %c0_0] : memref<8x32xf32, #tpu.memory_space<vmem>>, vector<8x32xf32>
    %c0_1 = arith.constant 0 : index
    %c0_2 = arith.constant 0 : index
    %1 = vector.load %arg2[%c0_1, %c0_2] : memref<32x64xf32, #tpu.memory_space<vmem>>, vector<32x64xf32>
    %cst = arith.constant dense<0.000000e+00> : vector<8x64xf32>
    %2 = tpu.matmul %0, %1, %cst {dimension_numbers = #tpu.dot_dimension_numbers<[1], [0], [0], [1], [0, 0, 1, 1], [], []>} : vector<8x32xf32>, vector<32x64xf32>, vector<8x64xf32> -> vector<8x64xf32>
    %c0_3 = arith.constant 0 : index
    %c0_4 = arith.constant 0 : index
    %3 = vector.load %arg3[%c0_3, %c0_4] : memref<1x64xf32, #tpu.memory_space<vmem>>, vector<1x64xf32>
    %4 = vector.broadcast %3 : vector<1x64xf32> to vector<8x64xf32>
    %5 = arith.addf %2, %4 : vector<8x64xf32>
    %cst_5 = arith.constant 0.000000e+00 : f32
    %6 = vector.broadcast %cst_5 : f32 to vector<8x64xf32>
    %7 = arith.maximumf %5, %6 : vector<8x64xf32>
    %c0_6 = arith.constant 0 : index
    %c0_7 = arith.constant 0 : index
    %8 = vector.load %arg4[%c0_6, %c0_7] : memref<64x128xf32, #tpu.memory_space<vmem>>, vector<64x128xf32>
    %cst_8 = arith.constant dense<0.000000e+00> : vector<8x128xf32>
    %9 = tpu.matmul %7, %8, %cst_8 {dimension_numbers = #tpu.dot_dimension_numbers<[1], [0], [0], [1], [0, 0, 1, 1], [], []>} : vector<8x64xf32>, vector<64x128xf32>, vector<8x128xf32> -> vector<8x128xf32>
    %c0_9 = arith.constant 0 : index
    %c0_10 = arith.constant 0 : index
    %10 = vector.load %arg5[%c0_9, %c0_10] : memref<1x128xf32, #tpu.memory_space<vmem>>, vector<1x128xf32>
    %11 = vector.broadcast %10 : vector<1x128xf32> to vector<8x128xf32>
    %12 = arith.addf %9, %11 : vector<8x128xf32>
    %13 = tpu.iota {dimensions = array<i32: 1>} : vector<8x128xi32>
    %c2_i32 = arith.constant 2 : i32
    %14 = vector.broadcast %c2_i32 : i32 to vector<8x128xi32>
    %15 = arith.cmpi slt, %13, %14 : vector<8x128xi32>
    %cst_11 = arith.constant -1.000000e+30 : f32
    %16 = vector.broadcast %cst_11 : f32 to vector<8x128xf32>
    %17 = arith.select %15, %12, %16 : vector<8x128xi1>, vector<8x128xf32>
    %cst_12 = arith.constant dense<0xFF800000> : vector<8xf32>
    %18 = vector.multi_reduction <maximumf>, %17, %cst_12 [1] : vector<8x128xf32> to vector<8xf32>
    %19 = vector.shape_cast %18 : vector<8xf32> to vector<8x1xf32>
    %20 = vector.broadcast %19 : vector<8x1xf32> to vector<8x128xf32>
    %21 = arith.subf %17, %20 : vector<8x128xf32>
    %22 = math.exp %21 : vector<8x128xf32>
    %cst_13 = arith.constant dense<0.000000e+00> : vector<8xf32>
    %23 = vector.multi_reduction <add>, %22, %cst_13 [1] : vector<8x128xf32> to vector<8xf32>
    %24 = vector.shape_cast %23 : vector<8xf32> to vector<8x1xf32>
    %25 = tpu.reciprocal %24 : vector<8x1xf32> -> vector<8x1xf32>
    %26 = vector.broadcast %25 : vector<8x1xf32> to vector<8x128xf32>
    %27 = arith.mulf %22, %26 : vector<8x128xf32>
    %28 = math.log %24 : vector<8x1xf32>
    %29 = arith.mulf %27, %21 : vector<8x128xf32>
    %cst_14 = arith.constant dense<0.000000e+00> : vector<8xf32>
    %30 = vector.multi_reduction <add>, %29, %cst_14 [1] : vector<8x128xf32> to vector<8xf32>
    %31 = vector.shape_cast %30 : vector<8xf32> to vector<8x1xf32>
    %32 = arith.subf %28, %31 : vector<8x1xf32>
    %c2_i32_15 = arith.constant 2 : i32
    %33 = vector.broadcast %c2_i32_15 : i32 to vector<8x128xi32>
    %34 = arith.cmpi eq, %13, %33 : vector<8x128xi32>
    %35 = vector.shape_cast %32 : vector<8x1xf32> to vector<8x1xf32>
    %36 = vector.broadcast %35 : vector<8x1xf32> to vector<8x128xf32>
    %37 = arith.select %34, %36, %27 : vector<8x128xi1>, vector<8x128xf32>
    %38 = vector.extract_strided_slice %37 {offsets = [0, 0], sizes = [8, 3], strides = [1, 1]} : vector<8x128xf32> to vector<8x3xf32>
    %c0_16 = arith.constant 0 : index
    %c0_17 = arith.constant 0 : index
    %39 = vector.load %arg6[%c0_16, %c0_17] : memref<8x3xf32, #tpu.memory_space<vmem>>, vector<8x3xf32>
    tpu.vector_store %arg6[%c0_16, %c0_17], %38 {strides = array<i32>} : memref<8x3xf32, #tpu.memory_space<vmem>>, vector<8x3xf32>,
    return
  }
  func.func @transform_0(%arg0: i32) -> (i32, i32) {
    %c0_i32 = arith.constant 0 : i32
    %c0_i32_0 = arith.constant 0 : i32
    return %arg0, %c0_i32 : i32, i32
  }
  func.func @transform_1(%arg0: i32) -> (i32, i32) {
    %c0_i32 = arith.constant 0 : i32
    %c0_i32_0 = arith.constant 0 : i32
    %c0_i32_1 = arith.constant 0 : i32
    return %c0_i32, %c0_i32_0 : i32, i32
  }
  func.func @transform_2(%arg0: i32) -> (i32, i32) {
    %c0_i32 = arith.constant 0 : i32
    %c0_i32_0 = arith.constant 0 : i32
    %c0_i32_1 = arith.constant 0 : i32
    return %c0_i32, %c0_i32_0 : i32, i32
  }
  func.func @transform_3(%arg0: i32) -> (i32, i32) {
    %c0_i32 = arith.constant 0 : i32
    %c0_i32_0 = arith.constant 0 : i32
    %c0_i32_1 = arith.constant 0 : i32
    return %c0_i32, %c0_i32_0 : i32, i32
  }
  func.func @transform_4(%arg0: i32) -> (i32, i32) {
    %c0_i32 = arith.constant 0 : i32
    %c0_i32_0 = arith.constant 0 : i32
    %c0_i32_1 = arith.constant 0 : i32
    return %c0_i32, %c0_i32_0 : i32, i32
  }
  func.func @transform_5(%arg0: i32) -> (i32, i32) {
    %c0_i32 = arith.constant 0 : i32
    %c0_i32_0 = arith.constant 0 : i32
    return %arg0, %c0_i32 : i32, i32
  }
}

</mosaic_0001>

<bundles_post_ra>
// kernel: tpu_custom_call.1
= control target key start
LH: loop header
LB: loop body
LE: loop exit
PB: predicated region body
PF: predicated region fallthrough
CT: control target
= control target key end

     0   :  { %10 = vsyncpa [#allocation3], 0  ;;  %s503_s0 = inlined_call_operand.hbm [shape: f32[8,32], index: 0, kind: input, shape index: {}]   ;;  %s504_s1 = inlined_call_operand.hbm [shape: f32[32,64], index: 1, kind: input, shape index: {}]   ;;  %s505_s2 = inlined_call_operand.vmem [shape: f32[1,64], index: 2, kind: input, shape index: {}]   ;;  %s506_s3 = inlined_call_operand.hbm [shape: f32[64,128], index: 3, kind: input, shape index: {}]   ;;  %s507_s4 = inlined_call_operand.vmem [shape: f32[1,128], index: 4, kind: input, shape index: {}]   ;;  %s508_s5 = inlined_call_operand.vmem [shape: f32[8,3], index: 5, kind: output, shape index: {}]  }
   0x1   :  { %11 = vsyncpa [#allocation5], 0  ;;  %s414_s18 = smov [#allocation4]   ;;  %s344_s22 = scalar_lea.hbm %s504_s1, 512 }
   0x2   :  { %s27_s19 = sshll.u32 %s414_s18, 4  ;;  %p345_p0 = scmp.ne.s32.totalorder %s504_s1, %s344_s22  ;;  %s28_s19 = int_to_ptr.vmem [resolvable:$true] %s27_s19 }
   0x3   :  { %p348_p1 = scmp.lt.u32.totalorder %s344_s22, %s504_s1 }
   0x5   :  { %p350_p2 = pnand %p348_p1, %p345_p0 }
   0x7   :  { %353 = shalt.err (!%p350_p2)
}
   0x8   :  { %s354_s27 = scalar_lea.vmem %s28_s19, 512  ;;  %p359_p4 = scmp.lt.s32.totalorder %s28_s19, %s28_s19 }
   0x9   :  { %p355_p3 = scmp.ne.s32.totalorder %s28_s19, %s354_s27  ;;  %p360_p5 = scmp.lt.s32.totalorder %s354_s27, %s354_s27 }
   0xb   :  { %p361_p6 = por %p360_p5, %p359_p4 }
   0xd   :  { %p362_p7 = pnand %p361_p6, %p355_p3 }
   0xf   :  { %365 = shalt.err (!%p362_p7)
}
  0x10   :  { %s415_s28 = smov 128   ;;  %s416_s29 = smov 8  }
  0x11   :  { %33 = dma.hbm_to_vmem [thread:$0]  %s504_s1, 512, %s28_s19, [#allocation5], %s415_s28, %s415_s28, %s416_s29  }
  0x12   :  { %s417_s7 = smov [#allocation2]   ;;  %s418_s9 = smov [#allocation6]  }
  0x13   :  { %s18_s8 = sshll.u32 %s417_s7, 4  ;;  %s41_s10 = sshll.u32 %s418_s9, 4  ;;  %s19_s8 = int_to_ptr.vmem [resolvable:$true] %s18_s8  ;;  %s42_s10 = int_to_ptr.vmem [resolvable:$true] %s41_s10 }
  0x14   :  { %s366_s13 = scalar_lea.hbm %s503_s0, 128 }
  0x15   :  { %p367_p8 = scmp.ne.s32.totalorder %s503_s0, %s366_s13  ;;  %p370_p9 = scmp.lt.u32.totalorder %s366_s13, %s503_s0 }
  0x17   :  { %p372_p10 = pnand %p370_p9, %p367_p8 }
  0x19   :  { %375 = shalt.err (!%p372_p10)
}
  0x1a   :  { %s376_s1 = scalar_lea.vmem %s19_s8, 128  ;;  %p381_p12 = scmp.lt.s32.totalorder %s19_s8, %s19_s8 }
  0x1b   :  { %p377_p11 = scmp.ne.s32.totalorder %s19_s8, %s376_s1  ;;  %p382_p13 = scmp.lt.s32.totalorder %s376_s1, %s376_s1 }
  0x1d   :  { %p383_p0 = por %p382_p13, %p381_p12 }
  0x1f   :  { %p384_p1 = pnand %p383_p0, %p377_p11 }
  0x21   :  { %387 = shalt.err (!%p384_p1)
}
  0x22   :  { %21 = dma.hbm_to_vmem [thread:$0]  %s503_s0, 128, %s19_s8, [#allocation3]  }
  0x23   :  { %s388_s22 = scalar_lea.hbm %s506_s3, 1024 }
  0x24   :  { %p389_p2 = scmp.ne.s32.totalorder %s506_s3, %s388_s22  ;;  %p392_p3 = scmp.lt.u32.totalorder %s388_s22, %s506_s3 }
  0x26   :  { %p394_p4 = pnand %p392_p3, %p389_p2 }
  0x28   :  { %397 = shalt.err (!%p394_p4)
}
  0x29   :  { %s398_s27 = scalar_lea.vmem %s42_s10, 1024  ;;  %p403_p6 = scmp.lt.s32.totalorder %s42_s10, %s42_s10 }
  0x2a   :  { %p399_p5 = scmp.ne.s32.totalorder %s42_s10, %s398_s27  ;;  %p404_p7 = scmp.lt.s32.totalorder %s398_s27, %s398_s27 }
  0x2c   :  { %p405_p8 = por %p404_p7, %p403_p6 }
  0x2e   :  { %p406_p9 = pnand %p405_p8, %p399_p5 }
  0x30   :  { %409 = shalt.err (!%p406_p9)
}
  0x31   :  { %47 = dma.hbm_to_vmem [thread:$0]  %s506_s3, 1024, %s42_s10, [#allocation5], %s415_s28, %s415_s28, %s416_s29  }
  0x32   :  { %410 = dma.done.wait [#allocation3], 128  }
  0x33   :  { %411 = vsyncadd [#allocation3], 4294967168 }
  0x34   :  { %412 = dma.done.wait [#allocation5], 1536  }
  0x35   :  { %413 = vsyncadd [#allocation5], 4294965760  ;;  %v419_v0 = vmov 0.0|0.0   ;;  %vm420_vm0 = vmmov 0   ;;  %v421_v1 = vmov 0.0   ;;  %v60_v2 = vld [vmem:[#allocation4] sm:$0xff]  ;;  %v235_v26 = vlaneseq }
  0x36   :  { %312 = vmatprep.subr.bf16.mxu0 %v419_v0  ;;  %290 = vmatprep.mubr.msk.f32.mxu0 %vm420_vm0, %v421_v1  ;;  %v61_v3 = vld [vmem:[#allocation4 + $0x8] sm:$0xff]  ;;  %v62_v4 = vld [vmem:[#allocation4 + $0x10] sm:$0xff]  ;;  %v63_v6 = vld [vmem:[#allocation4 + $0x18] sm:$0xff]  ;;  %vm71_vm1 = vcmask 261120   ;;  %vm161_vm2 = vcmask 523264   ;;  %vm256_vm5 = vcmask 23552  }
  0x37   :  { %318 = vmatprep.subr.bf16.mxu1 %v419_v0  ;;  %309 = vmatprep.mubr.msk.f32.mxu1 %vm420_vm0, %v421_v1  ;;  %v313_v5 = vpack.c.bf16 %v61_v3, %v60_v2  ;;  %v146_v7 = vld [vmem:[#allocation6] sm:$0xff]  ;;  %v147_v8 = vld [vmem:[#allocation6 + $0x8] sm:$0xff]  ;;  %v148_v9 = vld [vmem:[#allocation6 + $0x10] sm:$0xff]  ;;  %v316_v11 = vpack.c.bf16 %v63_v6, %v62_v4  ;;  %v236_v27 = vand.u32 127, %v235_v26 }
  0x38   :  { %v149_v10 = vld [vmem:[#allocation6 + $0x18] sm:$0xff]  ;;  %v319_v12 = vpack.c.bf16 %v147_v8, %v146_v7  ;;  %v150_v14 = vld [vmem:[#allocation6 + $0x20] sm:$0xff]  ;;  %v151_v15 = vld [vmem:[#allocation6 + $0x28] sm:$0xff] }
  0x39   :  { %314 = vmatpush3.bf16.msra.mxu0 %v313_v5  ;;  %v322_v13 = vpack.c.bf16 %v149_v10, %v148_v9  ;;  %v59_v16 = vld [vmem:[#allocation2] sm:$0xff]  ;;  %v325_v17 = vpack.c.bf16 %v151_v15, %v150_v14  ;;  %v152_v18 = vld [vmem:[#allocation6 + $0x30] sm:$0xff]  ;;  %vm237_vm3 = vcmp.lt.s32.totalorder %v236_v27, 2  ;;  %vm254_vm4 = vcmp.eq.s32.totalorder %v236_v27, 2 }
  0x3a   :  { %315 = vmatprep.subr.bf16.mxu0 %v419_v0  ;;  %320 = vmatpush3.bf16.msra.mxu1 %v319_v12  ;;  %v153_v19 = vld [vmem:[#allocation6 + $0x38] sm:$0xff] }
  0x3b   :  { %321 = vmatprep.subr.bf16.mxu1 %v419_v0  ;;  %v328_v20 = vpack.c.bf16 %v153_v19, %v152_v18  ;;  %v264_v21 = vld [vmem:[%s505_s2] ss:$0 sm:$0xff] }
  0x3c   :  { %v266_v28 = vld [vmem:[%s507_s4] ss:$0 sm:$0xff] }
  0x3d   :  { %317 = vmatpush3.bf16.msra.mxu0 %v316_v11 }
  0x3e   :  { %323 = vmatpush3.bf16.msra.mxu1 %v322_v13 }
  0x3f   :  { %324 = vmatprep.subr.bf16.mxu1 %v419_v0 }
  0x40   :  { %291 = vmatmul.mubr.msk.f32.vlgmr.msra.gmra.mrb[0].mxu0 %vm71_vm1, %v59_v16 }
  0x42   :  { %326 = vmatpush3.bf16.msra.mxu1 %v325_v17 }
  0x43   :  { %327 = vmatprep.subr.bf16.mxu1 %v419_v0 }
  0x46   :  { %329 = vmatpush3.bf16.msra.mxu1 %v328_v20 }
 0x113   :  { %v141_v22 = vpop.f32.mrb[0].mxu0 }
 0x114   :  { %v142_v23 = vadd.f32 %v264_v21, %v141_v22  ;;  %v292_v24 = vpop.f32.mrb[1].mxu0 }
 0x116   :  { %v145_v25 = vmax.f32 %v142_v23, 0.0 }
 0x118   :  { %310 = vmatmul.mubr.msk.f32.vlgmr.msra.gmra.mrb[0].mxu1 %vm161_vm2, %v145_v25 }
 0x1eb   :  { %v231_v29 = vpop.f32.mrb[0].mxu1 }
 0x1ec   :  { %v232_v30 = vadd.f32 %v266_v28, %v231_v29  ;;  %v311_v31 = vpop.f32.mrb[1].mxu1 }
 0x1ee   :  { %v238_v32 = vsel %vm237_vm3, %v232_v30, -1e+30 }
 0x1ef   :  { %239 = vmax.xlane.f32.xlu0 %v238_v32 }
 0x27c   :  { %v240_v33 = vpop.xlane.xlu0 %239 }
 0x27d   :  { %v241_v34 = vsub.f32 %v238_v32, %v240_v33 }
 0x27f   :  { %v242_v35 = vmul.f32 1.442695, %v241_v34 }
 0x281   :  { %338 = vpow2.f32 %v242_v35 }
 0x28b   :  { %v339_v36 = vpop.eup %338 }
 0x28c   :  { %244 = vadd.xlane.f32.xlu0 %v339_v36 }
 0x319   :  { %v245_v37 = vpop.xlane.xlu0 %244 }
 0x31a   :  { %340 = vrcp.f32 %v245_v37 }
 0x31b   :  { %342 = vlog2.f32 %v245_v37 }
 0x324   :  { %v341_v38 = vpop.eup %340 }
 0x325   :  { %v247_v39 = vmul.f32 %v341_v38, %v339_v36  ;;  %v343_v41 = vpop.eup %342 }
 0x326   :  { %v249_v42 = vmul.f32 0.6931472, %v343_v41 }
 0x327   :  { %v250_v40 = vmul.f32 %v247_v39, %v241_v34 }
 0x329   :  { %251 = vadd.xlane.f32.xlu1 %v250_v40 }
 0x3b6   :  { %v252_v43 = vpop.xlane.xlu1 %251 }
 0x3b7   :  { %v253_v44 = vsub.f32 %v249_v42, %v252_v43 }
 0x3b9   :  { %v255_v45 = vsel %vm254_vm4, %v253_v44, %v247_v39 }
 0x3ba   :  { %257 = vst.msk [vmem:[%s508_s5] sm:$0xff] %vm256_vm5, %v255_v45 }
 0x3bb   :  { %262 = vsyncpa [#allocation3], 1 }
 0x3bc   :  { %263 = vsyncpa [#allocation5], 1 }

</bundles_post_ra>
